<compile_context>
chip_gen: v7x
topology: tpu7x:2x2x1
jax: 0.10.0
libtpu: 0.0.40
codegen_flags: <defaults>
</compile_context>

<pallas_src>
import functools
import operator

import jax
import jax.numpy as jnp
from jax.experimental import pallas as pl
from jax.experimental.pallas import tpu as pltpu

_LANE = 128
_MAX_LANE_MULT = 32                      # widest lane view considered: 32*128 = 4096
_MIN_STEP_IO = 1 << 20                   # ~1 MiB of HBM traffic per grid step minimum
_DEFAULT_BUDGET = (12 << 20, 32 << 20)   # (live double-buffer budget, scoped vmem limit)


def _sublane_multiple(itemsize):
    # Native sublane packing: 8 for 32-bit, 16 for 16-bit, 32 for 8-bit dtypes.
    return {4: 8, 2: 16, 1: 32}.get(itemsize, 8)


def _round_up(x, m):
    return ((x + m - 1) // m) * m


def _vmem_budgets():
    """Generation-aware (live double-buffer budget, scoped vmem limit) in bytes."""
    cap = None
    try:
        info = pltpu.get_tpu_info()
        for name in ("vmem_capacity_bytes", "vmem_size_bytes", "vmem_bytes"):
            cap = getattr(info, name, None)
            if cap:
                break
    except Exception:
        cap = None
    if not cap:
        return _DEFAULT_BUDGET
    if cap <= (80 << 20):
        # v7x-class: 64 MiB VMEM per TensorCore -> bigger steps, but keep headroom.
        return 20 << 20, 44 << 20
    # v5e / v6e class: 128 MiB VMEM -> large tiles are free.
    return 28 << 20, 64 << 20


def _lane_view(n_units, s):
    """Pick a (W, rows) 2D view for n_units 128-element units (reshape only)."""
    best_k = 1
    for k in range(1, min(_MAX_LANE_MULT, n_units) + 1):
        if n_units % k == 0 and (n_units // k) >= s:
            best_k = k
    if n_units < s:
        for k in range(1, min(_MAX_LANE_MULT, n_units) + 1):
            if n_units % k == 0:
                best_k = k
    return _LANE * best_k, n_units // best_k


def _choose_row_tile(rows, W, n_in, itemsize, acc_itemsize, s, vmem_budget):
    """Rows-per-block and grid size: big blocks, pipelined + balanced grid."""
    # Live VMEM per block-row: (n_in+1) double-buffered blocks + one accumulator temp.
    per_row_live = W * ((n_in + 1) * 2 * itemsize + acc_itemsize)
    tr_cap = max(s, (vmem_budget // per_row_live) // s * s)

    # How many grid steps do we want? Enough to pipeline and balance both v7x
    # TensorCores, but never so many that the ~0.35us per-step overhead shows.
    io_per_row = (n_in + 1) * W * itemsize
    total_io = io_per_row * rows
    if total_io >= 8 * _MIN_STEP_IO:
        target_steps = 8          # >=4 steps per TC on v7x: DMA/compute overlap, even load
    elif total_io >= 2 * _MIN_STEP_IO:
        target_steps = 2          # one step per TC
    else:
        target_steps = 1          # tiny: single block

    target_tr = max(s, min(tr_cap, _round_up(pl.cdiv(rows, target_steps), s)))
    if target_tr >= rows:
        return rows, 1            # single full block (block == full dim, always legal)

    # Search within ~25% of the target for a tile that (a) divides rows exactly
    # (no masked trailing vst / undersized final DMA) and (b) yields an even
    # block count (balanced megacore split).
    lo = max(s, (int(target_tr * 0.75) // s) * s)
    hi = min(tr_cap, _round_up(int(target_tr * 1.25), s))
    best = None
    cand, tried = lo, 0
    while cand <= hi and tried < 512:
        nb = pl.cdiv(rows, cand)
        key = (rows % cand == 0, nb % 2 == 0, -abs(cand - target_tr))
        if best is None or key > best[0]:
            best = (key, cand)
        cand += s
        tried += 1
    tr = best[1] if best is not None else target_tr
    return tr, pl.cdiv(rows, tr)


def _make_add_kernel(n_in, acc_dtype):
    def kernel(*refs):
        out_ref = refs[n_in]
        acc = refs[0][...].astype(acc_dtype)
        for i in range(1, n_in):
            acc = acc + refs[i][...].astype(acc_dtype)
        out_ref[...] = acc.astype(out_ref.dtype)
    return kernel


def _add_aligned_2d(xs2d, acc_dtype, vmem_budget, vmem_limit):
    """Sum same-shape (rows, W) arrays with a pipelined 1-D grid."""
    n_in = len(xs2d)
    rows, W = xs2d[0].shape
    dtype = xs2d[0].dtype
    itemsize = jnp.dtype(dtype).itemsize
    acc_itemsize = jnp.dtype(acc_dtype).itemsize
    s = _sublane_multiple(itemsize)

    tr, num_blocks = _choose_row_tile(rows, W, n_in, itemsize, acc_itemsize, s, vmem_budget)

    spec = pl.BlockSpec((tr, W), lambda i: (i, 0))
    return pl.pallas_call(
        _make_add_kernel(n_in, acc_dtype),
        out_shape=jax.ShapeDtypeStruct((rows, W), dtype),
        grid_spec=pltpu.PrefetchScalarGridSpec(
            num_scalar_prefetch=0,
            grid=(num_blocks,),
            in_specs=[spec] * n_in,
            out_specs=spec,
        ),
        compiler_params=pltpu.CompilerParams(
            dimension_semantics=("parallel",),
            vmem_limit_bytes=vmem_limit,
        ),
        cost_estimate=pl.CostEstimate(
            flops=(n_in - 1) * rows * W,
            transcendentals=0,
            bytes_accessed=(n_in + 1) * rows * W * itemsize,
        ),
    )(*xs2d)


def add_block(xs):
    """Elementwise sum of a list/tuple of same-shape arrays (AddBlock.forward)."""
    assert isinstance(xs, (list, tuple)), 'input to add block must be a list or tuple'
    assert len(xs) >= 1
    shape = xs[0].shape
    dtype = xs[0].dtype
    for x in xs:
        assert x.shape == shape and x.dtype == dtype

    n_in = len(xs)
    if n_in == 1:
        return xs[0]

    itemsize = jnp.dtype(dtype).itemsize
    if itemsize not in (1, 2, 4):
        # TODO(synk): 64-bit dtypes do not lower on TPU Pallas; use the fused XLA add.
        return functools.reduce(operator.add, xs)

    n_elem = 1
    for d in shape:
        n_elem *= d
    if n_elem == 0:
        return xs[0]

    # Accumulate narrow floats in f32 (memory-bound, so free), cast once on store.
    if jnp.issubdtype(dtype, jnp.floating) and itemsize < 4:
        acc_dtype = jnp.float32
    else:
        acc_dtype = dtype   # integers wrap in the input dtype, matching PyTorch semantics

    vmem_budget, vmem_limit = _vmem_budgets()
    s = _sublane_multiple(itemsize)

    def run_aligned(flat_list, units):
        W, rows = _lane_view(units, s)
        xs2d = [f.reshape(rows, W) for f in flat_list]
        out2d = _add_aligned_2d(xs2d, acc_dtype, vmem_budget, vmem_limit)
        return out2d.reshape(-1)

    rem = n_elem % _LANE
    if rem == 0:
        # Common path: pure (free) reshape of every input, no padding, no slicing.
        flats = [x.reshape(-1) for x in xs]
        return run_aligned(flats, n_elem // _LANE).reshape(shape)

    main = n_elem - rem
    if main == 0:
        # Fewer than 128 elements total: not worth a kernel launch.
        return functools.reduce(operator.add, xs)

    # Rare non-lane-aligned path: Pallas kernel over the 128-aligned prefix, a
    # tiny fused jnp add for the <128-element tail.  Avoids the 2x-traffic
    # jnp.pad round trip of the previous version.
    # TODO(synk): handle the tail in-kernel with a masked store to also avoid
    # the prefix-slice copies XLA makes for the custom-call operands.
    flats = [x.reshape(-1) for x in xs]
    head = run_aligned([f[:main] for f in flats], main // _LANE)
    tail = functools.reduce(operator.add, [f[main:] for f in flats])
    return jnp.concatenate([head, tail]).reshape(shape)


if __name__ == "__main__":
    key = jax.random.PRNGKey(0)
    k1, k2, k3, k4, k5, k6, k7, k8 = jax.random.split(key, 8)

    # Main check: small NCHW feature maps, 3 addends (single-block path).
    shape = (2, 4, 16, 16)
    x0 = jax.random.normal(k1, shape, dtype=jnp.float32)
    x1 = jax.random.normal(k2, shape, dtype=jnp.float32)
    x2 = jax.random.normal(k3, shape, dtype=jnp.float32)
    y = jax.block_until_ready(add_block([x0, x1, x2]))
    assert y.shape == shape and y.dtype == jnp.float32
    assert jnp.allclose(y, x0 + x1 + x2, atol=1e-6), "mismatch vs reference (main)"

    # Medium check: exercises the multi-step pipelined grid (even block count).
    shape2 = (8, 16, 64, 64)
    a0 = jax.random.normal(k4, shape2, dtype=jnp.float32)
    a1 = jax.random.normal(k5, shape2, dtype=jnp.float32)
    a2 = jax.random.normal(k6, shape2, dtype=jnp.float32)
    z = jax.block_until_ready(add_block((a0, a1, a2)))
    assert z.shape == shape2
    assert jnp.allclose(z, a0 + a1 + a2, atol=1e-5), "mismatch vs reference (grid>1)"

    # bf16 check: narrow floats accumulate in f32 inside the kernel.
    shape3 = (2, 8, 16, 16)
    b0 = jax.random.normal(k7, shape3, dtype=jnp.bfloat16)
    b1 = jax.random.normal(k8, shape3, dtype=jnp.bfloat16)
    w = jax.block_until_ready(add_block([b0, b1]))
    ref = (b0.astype(jnp.float32) + b1.astype(jnp.float32)).astype(jnp.bfloat16)
    assert w.shape == shape3 and w.dtype == jnp.bfloat16
    assert jnp.allclose(w.astype(jnp.float32), ref.astype(jnp.float32), atol=3e-2), \
        "mismatch vs reference (bf16)"

    print("KERNEL_OK")
</pallas_src>

<mosaic_0001>
module attributes {stable_mosaic.version = 11 : i64} {
  func.func @kernel(%arg0: i32, %arg1: memref<8x256xf32, #tpu.memory_space<vmem>>, %arg2: memref<8x256xf32, #tpu.memory_space<vmem>>, %arg3: memref<8x256xf32, #tpu.memory_space<vmem>>, %arg4: memref<8x256xf32, #tpu.memory_space<vmem>>) attributes {dimension_semantics = [#tpu.dimension_semantics<parallel>], iteration_bounds = array<i64: 1>, scalar_prefetch = 0 : i64, scratch_operands = 0 : i64, tpu.core_type = #tpu.core_type<tc>, window_params = [{transform_indices = @transform_0, window_bounds = array<i64: 8, 256>}, {transform_indices = @transform_1, window_bounds = array<i64: 8, 256>}, {transform_indices = @transform_2, window_bounds = array<i64: 8, 256>}, {transform_indices = @transform_3, window_bounds = array<i64: 8, 256>}]} {
    %c0 = arith.constant 0 : index
    %c0_0 = arith.constant 0 : index
    %0 = vector.load %arg1[%c0, %c0_0] : memref<8x256xf32, #tpu.memory_space<vmem>>, vector<8x256xf32>
    %c0_1 = arith.constant 0 : index
    %c0_2 = arith.constant 0 : index
    %1 = vector.load %arg2[%c0_1, %c0_2] : memref<8x256xf32, #tpu.memory_space<vmem>>, vector<8x256xf32>
    %2 = arith.addf %0, %1 : vector<8x256xf32>
    %c0_3 = arith.constant 0 : index
    %c0_4 = arith.constant 0 : index
    %3 = vector.load %arg3[%c0_3, %c0_4] : memref<8x256xf32, #tpu.memory_space<vmem>>, vector<8x256xf32>
    %4 = arith.addf %2, %3 : vector<8x256xf32>
    %c0_5 = arith.constant 0 : index
    %c0_6 = arith.constant 0 : index
    %5 = vector.load %arg4[%c0_5, %c0_6] : memref<8x256xf32, #tpu.memory_space<vmem>>, vector<8x256xf32>
    tpu.vector_store %arg4[%c0_5, %c0_6], %4 {strides = array<i32>} : memref<8x256xf32, #tpu.memory_space<vmem>>, vector<8x256xf32>,
    return
  }
  func.func @transform_0(%arg0: i32) -> (i32, i32) {
    %c0_i32 = arith.constant 0 : i32
    %c0_i32_0 = arith.constant 0 : i32
    return %arg0, %c0_i32 : i32, i32
  }
  func.func @transform_1(%arg0: i32) -> (i32, i32) {
    %c0_i32 = arith.constant 0 : i32
    %c0_i32_0 = arith.constant 0 : i32
    return %arg0, %c0_i32 : i32, i32
  }
  func.func @transform_2(%arg0: i32) -> (i32, i32) {
    %c0_i32 = arith.constant 0 : i32
    %c0_i32_0 = arith.constant 0 : i32
    return %arg0, %c0_i32 : i32, i32
  }
  func.func @transform_3(%arg0: i32) -> (i32, i32) {
    %c0_i32 = arith.constant 0 : i32
    %c0_i32_0 = arith.constant 0 : i32
    return %arg0, %c0_i32 : i32, i32
  }
}

</mosaic_0001>

<bundles_post_ra>
// kernel: tpu_custom_call.1
= control target key start
LH: loop header
LB: loop body
LE: loop exit
PB: predicated region body
PF: predicated region fallthrough
CT: control target
= control target key end

     0   :  { %8 = vsyncpa [#allocation3], 0  ;;  %s248_s0 = inlined_call_operand.hbm [shape: f32[8,256], index: 0, kind: input, shape index: {}]   ;;  %s249_s1 = inlined_call_operand.hbm [shape: f32[8,256], index: 1, kind: input, shape index: {}]   ;;  %s250_s2 = inlined_call_operand.hbm [shape: f32[8,256], index: 2, kind: input, shape index: {}]   ;;  %s251_s3 = inlined_call_operand.hbm [shape: f32[8,256], index: 3, kind: output, shape index: {}]  }
   0x1   :  { %9 = vsyncpa [#allocation6], 0 }
   0x2   :  { %10 = vsyncpa [#allocation4], 0  ;;  %s176_s12 = smov [#allocation5]   ;;  %s177_s14 = smov [#allocation2]  }
   0x3   :  { %s27_s13 = sshll.u32 %s176_s12, 4  ;;  %s17_s15 = sshll.u32 %s177_s14, 4  ;;  %s28_s13 = int_to_ptr.vmem [resolvable:$true] %s27_s13  ;;  %s18_s15 = int_to_ptr.vmem [resolvable:$true] %s17_s15 }
   0x4   :  { %s82_s18 = scalar_lea.hbm %s249_s1, 256 }
   0x5   :  { %p83_p0 = scmp.ne.s32.totalorder %s249_s1, %s82_s18  ;;  %p86_p1 = scmp.lt.u32.totalorder %s82_s18, %s249_s1 }
   0x7   :  { %p88_p2 = pnand %p86_p1, %p83_p0 }
   0x9   :  { %91 = shalt.err (!%p88_p2)
}
   0xa   :  { %s92_s23 = scalar_lea.vmem %s28_s13, 256  ;;  %p97_p4 = scmp.lt.s32.totalorder %s28_s13, %s28_s13 }
   0xb   :  { %p93_p3 = scmp.ne.s32.totalorder %s28_s13, %s92_s23  ;;  %p98_p5 = scmp.lt.s32.totalorder %s92_s23, %s92_s23 }
   0xd   :  { %p99_p6 = por %p98_p5, %p97_p4 }
   0xf   :  { %p100_p7 = pnand %p99_p6, %p93_p3 }
  0x11   :  { %103 = shalt.err (!%p100_p7)
}
  0x12   :  { %30 = dma.hbm_to_vmem [thread:$0]  %s249_s1, 256, %s28_s13, [#allocation6]  }
  0x13   :  { %s104_s28 = scalar_lea.hbm %s248_s0, 256 }
  0x14   :  { %p105_p8 = scmp.ne.s32.totalorder %s248_s0, %s104_s28  ;;  %p108_p9 = scmp.lt.u32.totalorder %s104_s28, %s248_s0 }
  0x16   :  { %p110_p10 = pnand %p108_p9, %p105_p8 }
  0x18   :  { %113 = shalt.err (!%p110_p10)
}
  0x19   :  { %s114_s6 = scalar_lea.vmem %s18_s15, 256  ;;  %p119_p12 = scmp.lt.s32.totalorder %s18_s15, %s18_s15 }
  0x1a   :  { %p115_p11 = scmp.ne.s32.totalorder %s18_s15, %s114_s6  ;;  %p120_p13 = scmp.lt.s32.totalorder %s114_s6, %s114_s6 }
  0x1c   :  { %p121_p0 = por %p120_p13, %p119_p12 }
  0x1e   :  { %p122_p1 = pnand %p121_p0, %p115_p11 }
  0x20   :  { %125 = shalt.err (!%p122_p1)
}
  0x21   :  { %20 = dma.hbm_to_vmem [thread:$0]  %s248_s0, 256, %s18_s15, [#allocation3]  }
  0x22   :  { %s178_s8 = smov [#allocation7]   ;;  %s126_s12 = scalar_lea.hbm %s250_s2, 256 }
  0x23   :  { %s37_s9 = sshll.u32 %s178_s8, 4  ;;  %p127_p2 = scmp.ne.s32.totalorder %s250_s2, %s126_s12  ;;  %s38_s9 = int_to_ptr.vmem [resolvable:$true] %s37_s9 }
  0x24   :  { %p130_p3 = scmp.lt.u32.totalorder %s126_s12, %s250_s2 }
  0x26   :  { %p132_p4 = pnand %p130_p3, %p127_p2 }
  0x28   :  { %135 = shalt.err (!%p132_p4)
}
  0x29   :  { %s136_s18 = scalar_lea.vmem %s38_s9, 256  ;;  %p141_p6 = scmp.lt.s32.totalorder %s38_s9, %s38_s9 }
  0x2a   :  { %p137_p5 = scmp.ne.s32.totalorder %s38_s9, %s136_s18  ;;  %p142_p7 = scmp.lt.s32.totalorder %s136_s18, %s136_s18 }
  0x2c   :  { %p143_p8 = por %p142_p7, %p141_p6 }
  0x2e   :  { %p144_p9 = pnand %p143_p8, %p137_p5 }
  0x30   :  { %147 = shalt.err (!%p144_p9)
}
  0x31   :  { %40 = dma.hbm_to_vmem [thread:$0]  %s250_s2, 256, %s38_s9, [#allocation6]  }
  0x32   :  { %170 = dma.done.wait [#allocation3], 256  }
  0x33   :  { %171 = vsyncadd [#allocation3], 4294967040 }
  0x34   :  { %172 = dma.done.wait [#allocation6], 512  }
  0x35   :  { %173 = vsyncadd [#allocation6], 4294966784  ;;  %v50_v0 = vld [vmem:[#allocation2] sm:$0xff]  ;;  %v52_v1 = vld [vmem:[#allocation5] sm:$0xff]  ;;  %s179_s19 = smov [#allocation8]  }
  0x36   :  { %v56_v2 = vld [vmem:[#allocation7] sm:$0xff]  ;;  %v54_v3 = vadd.f32 %v52_v1, %v50_v0  ;;  %v51_v4 = vld [vmem:[#allocation2 + $0x8] sm:$0xff]  ;;  %v53_v5 = vld [vmem:[#allocation5 + $0x8] sm:$0xff]  ;;  %s68_s20 = sshll.u32 %s179_s19, 4  ;;  %s69_s20 = int_to_ptr.vmem [resolvable:$true] %s68_s20 }
  0x37   :  { %v57_v6 = vld [vmem:[#allocation7 + $0x8] sm:$0xff]  ;;  %v55_v7 = vadd.f32 %v53_v5, %v51_v4  ;;  %s148_s2 = scalar_lea.vmem %s69_s20, 256  ;;  %p153_p11 = scmp.lt.s32.totalorder %s69_s20, %s69_s20 }
  0x38   :  { %v58_v8 = vadd.f32 %v56_v2, %v54_v3  ;;  %p149_p10 = scmp.ne.s32.totalorder %s69_s20, %s148_s2  ;;  %p154_p12 = scmp.lt.s32.totalorder %s148_s2, %s148_s2 }
  0x39   :  { %v59_v9 = vadd.f32 %v57_v6, %v55_v7 }
  0x3a   :  { %60 = vst [vmem:[#allocation8] sm:$0xff] %v58_v8  ;;  %p155_p13 = por %p154_p12, %p153_p11 }
  0x3b   :  { %61 = vst [vmem:[#allocation8 + $0x8] sm:$0xff] %v59_v9 }
  0x3c   :  { %p156_p0 = pnand %p155_p13, %p149_p10 }
  0x3e   :  { %159 = shalt.err (!%p156_p0)
}
  0x3f   :  { %s160_s23 = scalar_lea.hbm %s251_s3, 256 }
  0x40   :  { %p161_p1 = scmp.ne.s32.totalorder %s251_s3, %s160_s23  ;;  %p164_p2 = scmp.lt.u32.totalorder %s160_s23, %s251_s3 }
  0x42   :  { %p166_p3 = pnand %p164_p2, %p161_p1 }
  0x44   :  { %169 = shalt.err (!%p166_p3)
}
  0x45   :  { %71 = dma.vmem_to_hbm [thread:$0]  %s69_s20, 256, %s251_s3, [#allocation4]  }
  0x46   :  { %174 = dma.done.wait [#allocation4], 256  }
  0x47   :  { %175 = vsyncadd [#allocation4], 4294967040 }
  0x48   :  { %75 = vsyncpa [#allocation3], 1 }
  0x49   :  { %76 = vsyncpa [#allocation6], 1 }
  0x4a   :  { %77 = vsyncpa [#allocation4], 1 }

</bundles_post_ra>
